<compile_context>
chip_gen: v7x
topology: tpu7x:2x2x1
jax: 0.10.0
libtpu: 0.0.40
codegen_flags: <defaults>
</compile_context>

<pallas_src>
import functools
import itertools

import jax
import jax.numpy as jnp
from jax import lax
from jax.experimental import pallas as pl
from jax.experimental.pallas import tpu as pltpu

LN_EPS = 1e-5

# Layer widths of the PyTorch module (fc4 output is hard-coded to 4 there).
D1, D2, D3, D_OUT = 32, 64, 32, 4

# ---- packed-parameter layout (all offsets are static Python ints) ----------
# Weight slab: rows = [w1 | w2 | w3 | w4] in (out, in) PyTorch layout.
_W_ROWS = (D1, D2, D3, D_OUT)                    # (32, 64, 32, 4) -> 132 rows
_W_OFFS = tuple(itertools.accumulate((0,) + _W_ROWS[:-1]))   # (0, 32, 96, 128)
# Vector slab: column vectors [b1 g1 be1 | b2 g2 be2 | b3 g3 be3 | b4].
_V_SIZES = (D1, D1, D1, D2, D2, D2, D3, D3, D3, D_OUT)
_V_OFFS = tuple(itertools.accumulate((0,) + _V_SIZES[:-1]))
_V_TOTAL = sum(_V_SIZES)                         # 388


def _round_up(x, m):
    return (x + m - 1) // m * m


def _mlp_kernel(xT_ref, wpack_ref, vpack_ref, oT_ref, *, d_in):
    """Batch-on-lanes fused MLP: activations are (features, batch_tile)."""
    in_dims = (d_in, D1, D2, D3)

    def weight(li):
        o = _W_OFFS[li]
        return wpack_ref[o:o + _W_ROWS[li], 0:in_dims[li]]       # (out, in)

    def vec(vi):
        o = _V_OFFS[vi]
        return vpack_ref[o:o + _V_SIZES[vi], :]                  # (F, 1)

    h = xT_ref[...].astype(jnp.float32)                          # (d_in, TB)

    # fc -> LayerNorm -> ReLU for layers 1..3 (unrolled at trace time).
    for li in range(3):
        w = weight(li)
        b, g, be = vec(3 * li), vec(3 * li + 1), vec(3 * li + 2)
        f = _W_ROWS[li]
        h = jnp.dot(w, h, preferred_element_type=jnp.float32) + b   # (f, TB)
        # One-pass LayerNorm over the feature (sublane) axis.
        inv_n = 1.0 / f
        mean = jnp.sum(h, axis=0, keepdims=True) * inv_n             # (1, TB)
        msq = jnp.sum(h * h, axis=0, keepdims=True) * inv_n          # (1, TB)
        var = msq - mean * mean
        h = (h - mean) * lax.rsqrt(var + LN_EPS) * g + be
        h = jnp.maximum(h, 0.0)

    # fc4 (no LayerNorm / activation).  Lane-dense (4, TB) store.
    out = jnp.dot(weight(3), h, preferred_element_type=jnp.float32) + vec(9)
    oT_ref[...] = out.astype(oT_ref.dtype)


def nn_forward(x, wpack, vpack, *, tile_b=1024, input_dtype=None,
               interpret=False):
    """x: (batch, in_features) -> (batch, 4)."""
    batch, d_in = x.shape

    # Batch tile: multiple of 128, capped (VMEM use per step is tiny:
    # activations <= (64, tile) f32, params ~100 KiB — far below v7x's 64 MiB).
    tile = min(int(tile_b), _round_up(batch, 128))
    padded = _round_up(batch, tile)

    xT = x.T                                         # (d_in, batch)
    if padded != batch:
        xT = jnp.pad(xT, ((0, 0), (0, padded - batch)))
    if input_dtype is not None:                      # e.g. jnp.bfloat16 to halve HBM reads
        xT = xT.astype(input_dtype)

    grid_spec = pltpu.PrefetchScalarGridSpec(
        num_scalar_prefetch=0,
        grid=(padded // tile,),
        in_specs=[
            # batch-tiled input, double-buffered HBM->VMEM pipeline
            pl.BlockSpec((d_in, tile), lambda i: (0, i)),
            # packed params: constant index_map -> resident across grid steps
            pl.BlockSpec(wpack.shape, lambda i: (0, 0)),
            pl.BlockSpec(vpack.shape, lambda i: (0, 0)),
        ],
        out_specs=pl.BlockSpec((D_OUT, tile), lambda i: (0, i)),
    )

    outT = pl.pallas_call(
        functools.partial(_mlp_kernel, d_in=d_in),
        out_shape=jax.ShapeDtypeStruct((D_OUT, padded), jnp.float32),
        grid_spec=grid_spec,
        compiler_params=pltpu.CompilerParams(
            dimension_semantics=("parallel",),        # v7x: shard batch across 2 TCs
            vmem_limit_bytes=32 * 1024 * 1024,
        ),
        interpret=interpret,
    )(xT, wpack, vpack)

    return outT[:, :batch].T                          # back to (batch, 4)


def init_params(key, input_size):
    """Synthetic init matching the PyTorch module's shapes.

    Linear weights stored PyTorch-style as (out, in); biases / LN params 1-D.
    """
    dims = [(input_size, D1), (D1, D2), (D2, D3), (D3, D_OUT)]
    params = {}
    keys = jax.random.split(key, 8)
    ki = 0
    for i, (fin, fout) in enumerate(dims, start=1):
        bound = 1.0 / (fin ** 0.5)
        params[f"w{i}"] = jax.random.uniform(
            keys[ki], (fout, fin), jnp.float32, -bound, bound); ki += 1
        params[f"b{i}"] = jax.random.uniform(
            keys[ki], (fout,), jnp.float32, -bound, bound); ki += 1
    # LayerNorm affine params: gamma=1, beta=0 (PyTorch default init).
    for i, f in zip((1, 2, 3), (D1, D2, D3)):
        params[f"g{i}"] = jnp.ones((f,), jnp.float32)
        params[f"be{i}"] = jnp.zeros((f,), jnp.float32)
    return params


def pack_params(params):
    """Pack the 14 parameter tensors into 2 arrays (weight slab + vector slab)."""
    d_in = params["w1"].shape[1]
    wcols = max(d_in, D1, D2, D3)
    wpack = jnp.zeros((sum(_W_ROWS), wcols), jnp.float32)
    for li in range(4):
        w = params[f"w{li + 1}"]                     # (out, in)
        r, c = w.shape
        o = _W_OFFS[li]
        wpack = wpack.at[o:o + r, 0:c].set(w)

    vecs = [params["b1"], params["g1"], params["be1"],
            params["b2"], params["g2"], params["be2"],
            params["b3"], params["g3"], params["be3"],
            params["b4"]]
    vpack = jnp.zeros((_V_TOTAL, 1), jnp.float32)
    for off, size, v in zip(_V_OFFS, _V_SIZES, vecs):
        vpack = vpack.at[off:off + size, 0].set(v)
    return wpack, vpack


def nn_forward_ref(x, p):
    """Plain-JAX reference (standard batch-major layout) for sanity checking."""
    def ln(h, g, b):
        m = jnp.mean(h, axis=-1, keepdims=True)
        v = jnp.mean((h - m) ** 2, axis=-1, keepdims=True)
        return (h - m) / jnp.sqrt(v + LN_EPS) * g + b

    h = jnp.maximum(ln(x @ p["w1"].T + p["b1"], p["g1"], p["be1"]), 0.0)
    h = jnp.maximum(ln(h @ p["w2"].T + p["b2"], p["g2"], p["be2"]), 0.0)
    h = jnp.maximum(ln(h @ p["w3"].T + p["b3"], p["g3"], p["be3"]), 0.0)
    return h @ p["w4"].T + p["b4"]


if __name__ == "__main__":
    input_size = 16
    batch = 8

    key = jax.random.PRNGKey(0)
    k_params, k_x, k_x2 = jax.random.split(key, 3)
    params = init_params(k_params, input_size)
    wpack, vpack = pack_params(params)

    # Small benchmark-sized batch (single grid step, batch padded to 128 lanes).
    x = jax.random.normal(k_x, (batch, input_size), jnp.float32)
    out = jax.block_until_ready(nn_forward(x, wpack, vpack))
    ref = nn_forward_ref(x, params)
    assert out.shape == (batch, D_OUT)
    assert jnp.allclose(out, ref, atol=1e-4, rtol=1e-4), "mismatch vs reference (batch=8)"

    # Exercise a multi-step grid + batch padding + resident packed weights.
    x2 = jax.random.normal(k_x2, (300, input_size), jnp.float32)
    out2 = jax.block_until_ready(nn_forward(x2, wpack, vpack, tile_b=128))
    ref2 = nn_forward_ref(x2, params)
    assert out2.shape == (300, D_OUT)
    assert jnp.allclose(out2, ref2, atol=1e-4, rtol=1e-4), "mismatch vs reference (batch=300)"

    print("KERNEL_OK")
</pallas_src>

<mosaic_0001>
module attributes {stable_mosaic.version = 11 : i64} {
  func.func @_mlp_kernel(%arg0: i32, %arg1: memref<16x128xf32, #tpu.memory_space<vmem>>, %arg2: memref<132x64xf32, #tpu.memory_space<vmem>>, %arg3: memref<388x1xf32, #tpu.memory_space<vmem>>, %arg4: memref<4x128xf32, #tpu.memory_space<vmem>>) attributes {dimension_semantics = [#tpu.dimension_semantics<parallel>], iteration_bounds = array<i64: 1>, scalar_prefetch = 0 : i64, scratch_operands = 0 : i64, tpu.core_type = #tpu.core_type<tc>, window_params = [{transform_indices = @transform_0, window_bounds = array<i64: 16, 128>}, {pipeline_mode = #tpu.pipeline_mode<synchronous>, transform_indices = @transform_1, window_bounds = array<i64: 132, 64>}, {pipeline_mode = #tpu.pipeline_mode<synchronous>, transform_indices = @transform_2, window_bounds = array<i64: 388, 1>}, {transform_indices = @transform_3, window_bounds = array<i64: 4, 128>}]} {
    %c0 = arith.constant 0 : index
    %c0_0 = arith.constant 0 : index
    %0 = vector.load %arg1[%c0, %c0_0] : memref<16x128xf32, #tpu.memory_space<vmem>>, vector<16x128xf32>
    %c0_1 = arith.constant 0 : index
    %c0_2 = arith.constant 0 : index
    %1 = vector.load %arg2[%c0_1, %c0_2] : memref<132x64xf32, #tpu.memory_space<vmem>>, vector<32x16xf32>
    %c0_3 = arith.constant 0 : index
    %c0_4 = arith.constant 0 : index
    %2 = vector.load %arg3[%c0_3, %c0_4] : memref<388x1xf32, #tpu.memory_space<vmem>>, vector<32x1xf32>
    %c32 = arith.constant 32 : index
    %c0_5 = arith.constant 0 : index
    %3 = vector.load %arg3[%c32, %c0_5] : memref<388x1xf32, #tpu.memory_space<vmem>>, vector<32x1xf32>
    %c64 = arith.constant 64 : index
    %c0_6 = arith.constant 0 : index
    %4 = vector.load %arg3[%c64, %c0_6] : memref<388x1xf32, #tpu.memory_space<vmem>>, vector<32x1xf32>
    %cst = arith.constant dense<0.000000e+00> : vector<32x128xf32>
    %5 = tpu.matmul %1, %0, %cst {dimension_numbers = #tpu.dot_dimension_numbers<[1], [0], [0], [1], [0, 0, 1, 1], [], []>} : vector<32x16xf32>, vector<16x128xf32>, vector<32x128xf32> -> vector<32x128xf32>
    %6 = vector.broadcast %2 : vector<32x1xf32> to vector<32x128xf32>
    %7 = arith.addf %5, %6 : vector<32x128xf32>
    %cst_7 = arith.constant dense<0.000000e+00> : vector<128xf32>
    %8 = vector.multi_reduction <add>, %7, %cst_7 [0] : vector<32x128xf32> to vector<128xf32>
    %9 = vector.shape_cast %8 : vector<128xf32> to vector<1x128xf32>
    %cst_8 = arith.constant 3.125000e-02 : f32
    %10 = vector.broadcast %cst_8 : f32 to vector<1x128xf32>
    %11 = arith.mulf %9, %10 : vector<1x128xf32>
    %12 = arith.mulf %7, %7 : vector<32x128xf32>
    %cst_9 = arith.constant dense<0.000000e+00> : vector<128xf32>
    %13 = vector.multi_reduction <add>, %12, %cst_9 [0] : vector<32x128xf32> to vector<128xf32>
    %14 = vector.shape_cast %13 : vector<128xf32> to vector<1x128xf32>
    %cst_10 = arith.constant 3.125000e-02 : f32
    %15 = vector.broadcast %cst_10 : f32 to vector<1x128xf32>
    %16 = arith.mulf %14, %15 : vector<1x128xf32>
    %17 = arith.mulf %11, %11 : vector<1x128xf32>
    %18 = arith.subf %16, %17 : vector<1x128xf32>
    %19 = vector.broadcast %11 : vector<1x128xf32> to vector<32x128xf32>
    %20 = arith.subf %7, %19 : vector<32x128xf32>
    %cst_11 = arith.constant 9.99999974E-6 : f32
    %21 = vector.broadcast %cst_11 : f32 to vector<1x128xf32>
    %22 = arith.addf %18, %21 : vector<1x128xf32>
    %23 = math.rsqrt %22 : vector<1x128xf32>
    %24 = vector.broadcast %23 : vector<1x128xf32> to vector<32x128xf32>
    %25 = arith.mulf %20, %24 : vector<32x128xf32>
    %26 = vector.broadcast %3 : vector<32x1xf32> to vector<32x128xf32>
    %27 = arith.mulf %25, %26 : vector<32x128xf32>
    %28 = vector.broadcast %4 : vector<32x1xf32> to vector<32x128xf32>
    %29 = arith.addf %27, %28 : vector<32x128xf32>
    %cst_12 = arith.constant 0.000000e+00 : f32
    %30 = vector.broadcast %cst_12 : f32 to vector<32x128xf32>
    %31 = arith.maximumf %29, %30 : vector<32x128xf32>
    %c32_13 = arith.constant 32 : index
    %c0_14 = arith.constant 0 : index
    %32 = vector.load %arg2[%c32_13, %c0_14] : memref<132x64xf32, #tpu.memory_space<vmem>>, vector<64x32xf32>
    %c96 = arith.constant 96 : index
    %c0_15 = arith.constant 0 : index
    %33 = vector.load %arg3[%c96, %c0_15] : memref<388x1xf32, #tpu.memory_space<vmem>>, vector<64x1xf32>
    %c160 = arith.constant 160 : index
    %c0_16 = arith.constant 0 : index
    %34 = vector.load %arg3[%c160, %c0_16] : memref<388x1xf32, #tpu.memory_space<vmem>>, vector<64x1xf32>
    %c224 = arith.constant 224 : index
    %c0_17 = arith.constant 0 : index
    %35 = vector.load %arg3[%c224, %c0_17] : memref<388x1xf32, #tpu.memory_space<vmem>>, vector<64x1xf32>
    %cst_18 = arith.constant dense<0.000000e+00> : vector<64x128xf32>
    %36 = tpu.matmul %32, %31, %cst_18 {dimension_numbers = #tpu.dot_dimension_numbers<[1], [0], [0], [1], [0, 0, 1, 1], [], []>} : vector<64x32xf32>, vector<32x128xf32>, vector<64x128xf32> -> vector<64x128xf32>
    %37 = vector.broadcast %33 : vector<64x1xf32> to vector<64x128xf32>
    %38 = arith.addf %36, %37 : vector<64x128xf32>
    %cst_19 = arith.constant dense<0.000000e+00> : vector<128xf32>
    %39 = vector.multi_reduction <add>, %38, %cst_19 [0] : vector<64x128xf32> to vector<128xf32>
    %40 = vector.shape_cast %39 : vector<128xf32> to vector<1x128xf32>
    %cst_20 = arith.constant 1.562500e-02 : f32
    %41 = vector.broadcast %cst_20 : f32 to vector<1x128xf32>
    %42 = arith.mulf %40, %41 : vector<1x128xf32>
    %43 = arith.mulf %38, %38 : vector<64x128xf32>
    %cst_21 = arith.constant dense<0.000000e+00> : vector<128xf32>
    %44 = vector.multi_reduction <add>, %43, %cst_21 [0] : vector<64x128xf32> to vector<128xf32>
    %45 = vector.shape_cast %44 : vector<128xf32> to vector<1x128xf32>
    %cst_22 = arith.constant 1.562500e-02 : f32
    %46 = vector.broadcast %cst_22 : f32 to vector<1x128xf32>
    %47 = arith.mulf %45, %46 : vector<1x128xf32>
    %48 = arith.mulf %42, %42 : vector<1x128xf32>
    %49 = arith.subf %47, %48 : vector<1x128xf32>
    %50 = vector.broadcast %42 : vector<1x128xf32> to vector<64x128xf32>
    %51 = arith.subf %38, %50 : vector<64x128xf32>
    %cst_23 = arith.constant 9.99999974E-6 : f32
    %52 = vector.broadcast %cst_23 : f32 to vector<1x128xf32>
    %53 = arith.addf %49, %52 : vector<1x128xf32>
    %54 = math.rsqrt %53 : vector<1x128xf32>
    %55 = vector.broadcast %54 : vector<1x128xf32> to vector<64x128xf32>
    %56 = arith.mulf %51, %55 : vector<64x128xf32>
    %57 = vector.broadcast %34 : vector<64x1xf32> to vector<64x128xf32>
    %58 = arith.mulf %56, %57 : vector<64x128xf32>
    %59 = vector.broadcast %35 : vector<64x1xf32> to vector<64x128xf32>
    %60 = arith.addf %58, %59 : vector<64x128xf32>
    %cst_24 = arith.constant 0.000000e+00 : f32
    %61 = vector.broadcast %cst_24 : f32 to vector<64x128xf32>
    %62 = arith.maximumf %60, %61 : vector<64x128xf32>
    %c96_25 = arith.constant 96 : index
    %c0_26 = arith.constant 0 : index
    %63 = vector.load %arg2[%c96_25, %c0_26] : memref<132x64xf32, #tpu.memory_space<vmem>>, vector<32x64xf32>
    %c288 = arith.constant 288 : index
    %c0_27 = arith.constant 0 : index
    %64 = vector.load %arg3[%c288, %c0_27] : memref<388x1xf32, #tpu.memory_space<vmem>>, vector<32x1xf32>
    %c320 = arith.constant 320 : index
    %c0_28 = arith.constant 0 : index
    %65 = vector.load %arg3[%c320, %c0_28] : memref<388x1xf32, #tpu.memory_space<vmem>>, vector<32x1xf32>
    %c352 = arith.constant 352 : index
    %c0_29 = arith.constant 0 : index
    %66 = vector.load %arg3[%c352, %c0_29] : memref<388x1xf32, #tpu.memory_space<vmem>>, vector<32x1xf32>
    %cst_30 = arith.constant dense<0.000000e+00> : vector<32x128xf32>
    %67 = tpu.matmul %63, %62, %cst_30 {dimension_numbers = #tpu.dot_dimension_numbers<[1], [0], [0], [1], [0, 0, 1, 1], [], []>} : vector<32x64xf32>, vector<64x128xf32>, vector<32x128xf32> -> vector<32x128xf32>
    %68 = vector.broadcast %64 : vector<32x1xf32> to vector<32x128xf32>
    %69 = arith.addf %67, %68 : vector<32x128xf32>
    %cst_31 = arith.constant dense<0.000000e+00> : vector<128xf32>
    %70 = vector.multi_reduction <add>, %69, %cst_31 [0] : vector<32x128xf32> to vector<128xf32>
    %71 = vector.shape_cast %70 : vector<128xf32> to vector<1x128xf32>
    %cst_32 = arith.constant 3.125000e-02 : f32
    %72 = vector.broadcast %cst_32 : f32 to vector<1x128xf32>
    %73 = arith.mulf %71, %72 : vector<1x128xf32>
    %74 = arith.mulf %69, %69 : vector<32x128xf32>
    %cst_33 = arith.constant dense<0.000000e+00> : vector<128xf32>
    %75 = vector.multi_reduction <add>, %74, %cst_33 [0] : vector<32x128xf32> to vector<128xf32>
    %76 = vector.shape_cast %75 : vector<128xf32> to vector<1x128xf32>
    %cst_34 = arith.constant 3.125000e-02 : f32
    %77 = vector.broadcast %cst_34 : f32 to vector<1x128xf32>
    %78 = arith.mulf %76, %77 : vector<1x128xf32>
    %79 = arith.mulf %73, %73 : vector<1x128xf32>
    %80 = arith.subf %78, %79 : vector<1x128xf32>
    %81 = vector.broadcast %73 : vector<1x128xf32> to vector<32x128xf32>
    %82 = arith.subf %69, %81 : vector<32x128xf32>
    %cst_35 = arith.constant 9.99999974E-6 : f32
    %83 = vector.broadcast %cst_35 : f32 to vector<1x128xf32>
    %84 = arith.addf %80, %83 : vector<1x128xf32>
    %85 = math.rsqrt %84 : vector<1x128xf32>
    %86 = vector.broadcast %85 : vector<1x128xf32> to vector<32x128xf32>
    %87 = arith.mulf %82, %86 : vector<32x128xf32>
    %88 = vector.broadcast %65 : vector<32x1xf32> to vector<32x128xf32>
    %89 = arith.mulf %87, %88 : vector<32x128xf32>
    %90 = vector.broadcast %66 : vector<32x1xf32> to vector<32x128xf32>
    %91 = arith.addf %89, %90 : vector<32x128xf32>
    %cst_36 = arith.constant 0.000000e+00 : f32
    %92 = vector.broadcast %cst_36 : f32 to vector<32x128xf32>
    %93 = arith.maximumf %91, %92 : vector<32x128xf32>
    %c128 = arith.constant 128 : index
    %c0_37 = arith.constant 0 : index
    %94 = vector.load %arg2[%c128, %c0_37] : memref<132x64xf32, #tpu.memory_space<vmem>>, vector<4x32xf32>
    %cst_38 = arith.constant dense<0.000000e+00> : vector<4x128xf32>
    %95 = tpu.matmul %94, %93, %cst_38 {dimension_numbers = #tpu.dot_dimension_numbers<[1], [0], [0], [1], [0, 0, 1, 1], [], []>} : vector<4x32xf32>, vector<32x128xf32>, vector<4x128xf32> -> vector<4x128xf32>
    %c384 = arith.constant 384 : index
    %c0_39 = arith.constant 0 : index
    %96 = vector.load %arg3[%c384, %c0_39] : memref<388x1xf32, #tpu.memory_space<vmem>>, vector<4x1xf32>
    %97 = vector.broadcast %96 : vector<4x1xf32> to vector<4x128xf32>
    %98 = arith.addf %95, %97 : vector<4x128xf32>
    %c0_40 = arith.constant 0 : index
    %c0_41 = arith.constant 0 : index
    %99 = vector.load %arg4[%c0_40, %c0_41] : memref<4x128xf32, #tpu.memory_space<vmem>>, vector<4x128xf32>
    tpu.vector_store %arg4[%c0_40, %c0_41], %98 {strides = array<i32>} : memref<4x128xf32, #tpu.memory_space<vmem>>, vector<4x128xf32>,
    return
  }
  func.func @transform_0(%arg0: i32) -> (i32, i32) {
    %c0_i32 = arith.constant 0 : i32
    %c0_i32_0 = arith.constant 0 : i32
    return %c0_i32, %arg0 : i32, i32
  }
  func.func @transform_1(%arg0: i32) -> (i32, i32) {
    %c0_i32 = arith.constant 0 : i32
    %c0_i32_0 = arith.constant 0 : i32
    %c0_i32_1 = arith.constant 0 : i32
    return %c0_i32, %c0_i32_0 : i32, i32
  }
  func.func @transform_2(%arg0: i32) -> (i32, i32) {
    %c0_i32 = arith.constant 0 : i32
    %c0_i32_0 = arith.constant 0 : i32
    %c0_i32_1 = arith.constant 0 : i32
    return %c0_i32, %c0_i32_0 : i32, i32
  }
  func.func @transform_3(%arg0: i32) -> (i32, i32) {
    %c0_i32 = arith.constant 0 : i32
    %c0_i32_0 = arith.constant 0 : i32
    return %c0_i32, %arg0 : i32, i32
  }
}

</mosaic_0001>

<bundles_post_ra>
// kernel: tpu_custom_call.1
= control target key start
LH: loop header
LB: loop body
LE: loop exit
PB: predicated region body
PF: predicated region fallthrough
CT: control target
= control target key end

     0   :  { %vm53_vm0 = vcmask 130048   ;;  %v1104_v3 = vmov 0   ;;  %s1403_s0 = inlined_call_operand.vmem [shape: f32[16,128], index: 0, kind: input, shape index: {}]   ;;  %s1404_s1 = inlined_call_operand.vmem [shape: f32[132,64], index: 1, kind: input, shape index: {}]   ;;  %s1405_s2 = inlined_call_operand.vmem [shape: f32[388,1], index: 2, kind: input, shape index: {}]   ;;  %s1406_s3 = inlined_call_operand.hbm [shape: f32[4,128], index: 3, kind: output, shape index: {}]  }
   0x1   :  { %v23_v0 = vld [vmem:[%s1405_s2 + $0x10] sm:$0xff]  ;;  %v21_v1 = vld [vmem:[%s1405_s2] sm:$0xff]  ;;  %1073 = vset.pattern.permute.xlu1 %v1104_v3  ;;  %1072 = vset.pattern.permute.xlu0 %v1104_v3  ;;  %v16_v4 = vld [vmem:[%s1403_s0 + $0x8] sm:$0xff] }
   0x2   :  { %v15_v2 = vld [vmem:[%s1403_s0] sm:$0xff]  ;;  %45 = vperm.xlu1 %1073, %v23_v0   ;;  %35 = vperm.xlu0 %1072, %v21_v1   ;;  %v24_v7 = vld [vmem:[%s1405_s2 + $0x18] sm:$0xff]  ;;  %v22_v8 = vld [vmem:[%s1405_s2 + $0x8] sm:$0xff] }
   0x3   :  { %v1033_v5 = vpack.c.bf16 %v16_v4, %v15_v2  ;;  %v17_v6 = vld [vmem:[%s1404_s1] sm:$0xff]  ;;  %v18_v9 = vld [vmem:[%s1404_s1 + $0x8] sm:$0xff]  ;;  %v19_v10 = vld [vmem:[%s1404_s1 + $0x10] sm:$0xff] }
   0x4   :  { %974 = vmatprep.mubr.msk.f32.mxu0 %vm53_vm0, %v17_v6  ;;  %v26_v11 = vld [vmem:[%s1405_s2 + $0x28] sm:$0xff]  ;;  %v25_v12 = vld [vmem:[%s1405_s2 + $0x20] sm:$0xff]  ;;  %v20_v13 = vld [vmem:[%s1404_s1 + $0x18] sm:$0xff] }
   0x5   :  { %1034 = vmatprep.subr.bf16.mxu0 %v1033_v5  ;;  %v30_v14 = vld [vmem:[%s1405_s2 + $0x48] sm:$0xff]  ;;  %v29_v15 = vld [vmem:[%s1405_s2 + $0x40] sm:$0xff]  ;;  %v28_v16 = vld [vmem:[%s1405_s2 + $0x38] sm:$0xff] }
   0x6   :  { %1036 = vmatpush3.bf16.msra.mxu0 %v1033_v5  ;;  %50 = vperm.xlu1 %1073, %v24_v7   ;;  %v27_v17 = vld [vmem:[%s1405_s2 + $0x30] sm:$0xff] }
   0x7   :  { %40 = vperm.xlu0 %1072, %v22_v8  }
   0x9   :  { %975 = vmatmul.mubr.msk.f32.vlgmr.msra.gmra.mrb[0].mxu0 %vm53_vm0, %v18_v9 }
   0xa   :  { %977 = vmatprep.mubr.msk.f32.mxu0 %vm53_vm0, %v19_v10  ;;  %194 = vperm.xlu1 %1073, %v26_v11  }
   0xb   :  { %189 = vperm.xlu0 %1072, %v25_v12  }
   0xd   :  { %978 = vmatmul.mubr.msk.f32.gmra.mrb[2].mxu0 %vm53_vm0, %v20_v13 }
   0xe   :  { %218 = vperm.xlu1 %1073, %v30_v14  }
   0xf   :  { %213 = vperm.xlu0 %1072, %v29_v15  }
  0x12   :  { %204 = vperm.xlu1 %1073, %v28_v16  }
  0x13   :  { %199 = vperm.xlu0 %1072, %v27_v17  }
  0x14   :  { %8 = vsyncpa [#allocation3], 0  ;;  %v32_v18 = vld [vmem:[%s1405_s2 + $0x58] sm:$0xff]  ;;  %v31_v19 = vld [vmem:[%s1405_s2 + $0x50] sm:$0xff]  ;;  %vm311_vm1 = vcmask 261120   ;;  %vm637_vm2 = vcmask 523264  }
  0x15   :  { %v248_v20 = vld [vmem:[%s1405_s2 + $0x68] sm:$0xff]  ;;  %v247_v21 = vld [vmem:[%s1405_s2 + $0x60] sm:$0xff]  ;;  %v250_v22 = vld [vmem:[%s1405_s2 + $0x78] sm:$0xff]  ;;  %vm1106_vm3 = vmmov 0   ;;  %s1108_s7 = smov [#allocation2]  }
  0x16   :  { %228 = vperm.xlu1 %1073, %v32_v18   ;;  %v249_v23 = vld [vmem:[%s1405_s2 + $0x70] sm:$0xff]  ;;  %v252_v24 = vld [vmem:[%s1405_s2 + $0x88] sm:$0xff]  ;;  %v251_v25 = vld [vmem:[%s1405_s2 + $0x80] sm:$0xff]  ;;  %s910_s8 = sshll.u32 %s1108_s7, 4  ;;  %s911_s8 = int_to_ptr.vmem [resolvable:$true] %s910_s8 }
  0x17   :  { %223 = vperm.xlu0 %1072, %v31_v19   ;;  %v254_v26 = vld [vmem:[%s1405_s2 + $0x98] sm:$0xff]  ;;  %v253_v27 = vld [vmem:[%s1405_s2 + $0x90] sm:$0xff]  ;;  %v256_v28 = vld [vmem:[%s1405_s2 + $0xa8] sm:$0xff]  ;;  %s1080_s9 = scalar_lea.vmem %s911_s8, 64  ;;  %p1085_p1 = scmp.lt.s32.totalorder %s911_s8, %s911_s8 }
  0x18   :  { %v255_v29 = vld [vmem:[%s1405_s2 + $0xa0] sm:$0xff]  ;;  %v264_v30 = vld [vmem:[%s1405_s2 + $0xe8] sm:$0xff]  ;;  %v258_v32 = vld [vmem:[%s1405_s2 + $0xb8] sm:$0xff]  ;;  %p1081_p0 = scmp.ne.s32.totalorder %s911_s8, %s1080_s9  ;;  %p1086_p2 = scmp.lt.s32.totalorder %s1080_s9, %s1080_s9 }
  0x19   :  { %v263_v31 = vld [vmem:[%s1405_s2 + $0xe0] sm:$0xff]  ;;  %v257_v33 = vld [vmem:[%s1405_s2 + $0xb0] sm:$0xff]  ;;  %v266_v34 = vld [vmem:[%s1405_s2 + $0xf8] sm:$0xff] }
  0x1a   :  { %278 = vperm.xlu1 %1073, %v248_v20   ;;  %v265_v35 = vld [vmem:[%s1405_s2 + $0xf0] sm:$0xff]  ;;  %v260_v36 = vld [vmem:[%s1405_s2 + $0xc8] sm:$0xff]  ;;  %v259_v37 = vld [vmem:[%s1405_s2 + $0xc0] sm:$0xff]  ;;  %p1087_p3 = por %p1086_p2, %p1085_p1 }
  0x1b   :  { %273 = vperm.xlu0 %1072, %v247_v21   ;;  %v268_v38 = vld [vmem:[%s1405_s2 + $0x108] sm:$0xff]  ;;  %v267_v39 = vld [vmem:[%s1405_s2 + $0x100] sm:$0xff]  ;;  %v262_v40 = vld [vmem:[%s1405_s2 + $0xd8] sm:$0xff] }
  0x1c   :  { %v261_v41 = vld [vmem:[%s1405_s2 + $0xd0] sm:$0xff]  ;;  %v270_v42 = vld [vmem:[%s1405_s2 + $0x118] sm:$0xff]  ;;  %v606_v44 = vld [vmem:[%s1405_s2 + $0x128] sm:$0xff]  ;;  %p1088_p4 = pnand %p1087_p3, %p1081_p0 }
  0x1d   :  { %v269_v43 = vld [vmem:[%s1405_s2 + $0x110] sm:$0xff]  ;;  %v605_v45 = vld [vmem:[%s1405_s2 + $0x120] sm:$0xff]  ;;  %v608_v46 = vld [vmem:[%s1405_s2 + $0x138] sm:$0xff] }
  0x1e   :  { %288 = vperm.xlu1 %1073, %v250_v22   ;;  %v607_v47 = vld [vmem:[%s1405_s2 + $0x130] sm:$0xff]  ;;  %v610_v48 = vld [vmem:[%s1405_s2 + $0x148] sm:$0xff]  ;;  %v609_v49 = vld [vmem:[%s1405_s2 + $0x140] sm:$0xff] }
  0x1f   :  { %283 = vperm.xlu0 %1072, %v249_v23   ;;  %v614_v50 = vld [vmem:[%s1405_s2 + $0x168] sm:$0xff]  ;;  %v613_v51 = vld [vmem:[%s1405_s2 + $0x160] sm:$0xff]  ;;  %v612_v52 = vld [vmem:[%s1405_s2 + $0x158] sm:$0xff] }
  0x20   :  { %v611_v53 = vld [vmem:[%s1405_s2 + $0x150] sm:$0xff]  ;;  %v616_v54 = vld [vmem:[%s1405_s2 + $0x178] sm:$0xff]  ;;  %v824_v56 = vld [vmem:[%s1405_s2 + $0x180] sm:$0xf] }
  0x21   :  { %v615_v55 = vld [vmem:[%s1405_s2 + $0x170] sm:$0xff]  ;;  %v239_v57 = vld [vmem:[%s1404_s1 + $0x20] sm:$0xff] }
  0x22   :  { %298 = vperm.xlu1 %1073, %v252_v24   ;;  %988 = vmatprep.mubr.msk.f32.mxu1 %vm311_vm1, %v239_v57 }
  0x23   :  { %293 = vperm.xlu0 %1072, %v251_v25  }
  0x26   :  { %308 = vperm.xlu1 %1073, %v254_v26  }
  0x27   :  { %303 = vperm.xlu0 %1072, %v253_v27  }
  0x2a   :  { %504 = vperm.xlu1 %1073, %v256_v28  }
  0x2b   :  { %499 = vperm.xlu0 %1072, %v255_v29  }
  0x2e   :  { %552 = vperm.xlu1 %1073, %v264_v30  }
  0x2f   :  { %547 = vperm.xlu0 %1072, %v263_v31  }
  0x32   :  { %514 = vperm.xlu1 %1073, %v258_v32  }
  0x33   :  { %509 = vperm.xlu0 %1072, %v257_v33  }
  0x36   :  { %562 = vperm.xlu1 %1073, %v266_v34  }
  0x37   :  { %557 = vperm.xlu0 %1072, %v265_v35  }
  0x3a   :  { %524 = vperm.xlu1 %1073, %v260_v36  }
  0x3b   :  { %519 = vperm.xlu0 %1072, %v259_v37  }
  0x3e   :  { %572 = vperm.xlu1 %1073, %v268_v38  }
  0x3f   :  { %567 = vperm.xlu0 %1072, %v267_v39  }
  0x42   :  { %534 = vperm.xlu1 %1073, %v262_v40  }
  0x43   :  { %529 = vperm.xlu0 %1072, %v261_v41  }
  0x46   :  { %582 = vperm.xlu1 %1073, %v270_v42  }
  0x47   :  { %577 = vperm.xlu0 %1072, %v269_v43  }
  0x4a   :  { %624 = vperm.xlu1 %1073, %v606_v44  }
  0x4b   :  { %619 = vperm.xlu0 %1072, %v605_v45  }
  0x4e   :  { %634 = vperm.xlu1 %1073, %v608_v46  }
  0x4f   :  { %629 = vperm.xlu0 %1072, %v607_v47  }
  0x52   :  { %778 = vperm.xlu1 %1073, %v610_v48  }
  0x53   :  { %773 = vperm.xlu0 %1072, %v609_v49  }
  0x56   :  { %802 = vperm.xlu1 %1073, %v614_v50  }
  0x57   :  { %797 = vperm.xlu0 %1072, %v613_v51  }
  0x5a   :  { %788 = vperm.xlu1 %1073, %v612_v52  }
  0x5b   :  { %783 = vperm.xlu0 %1072, %v611_v53  }
  0x5e   :  { %812 = vperm.xlu1 %1073, %v616_v54  }
  0x5f   :  { %807 = vperm.xlu0 %1072, %v615_v55  }
  0x63   :  { %827 = vperm.xlu0 %1072, %v824_v56  }
  0x81   :  { %v36_v58 = vpop.permute.xlu0 %35  ;;  %v46_v59 = vpop.permute.xlu1 %45 }
  0x85   :  { %v51_v5 = vpop.permute.xlu1 %50 }
  0x86   :  { %v41_v60 = vpop.permute.xlu0 %40 }
  0x89   :  { %v195_v35 = vpop.permute.xlu1 %194 }
  0x8a   :  { %v190_v36 = vpop.permute.xlu0 %189 }
  0x8d   :  { %v219_v39 = vpop.permute.xlu1 %218 }
  0x8e   :  { %v214_v40 = vpop.permute.xlu0 %213 }
  0x91   :  { %v205_v41 = vpop.permute.xlu1 %204 }
  0x92   :  { %v200_v42 = vpop.permute.xlu0 %199 }
  0x95   :  { %v229_v52 = vpop.permute.xlu1 %228 }
  0x96   :  { %v224_v53 = vpop.permute.xlu0 %223 }
  0xdc   :  { %v976_v61 = vpop.f32.mrb[0].mxu0 }
  0xdd   :  { %v138_v62 = vadd.f32 %v976_v61, %v41_v60  ;;  %v132_v63 = vpop.f32.mrb[1].mxu0 }
  0xde   :  { %v133_v0 = vadd.f32 %v132_v63, %v36_v58 }
  0xdf   :  { %v162_v1 = vmul.f32 %v138_v62, %v138_v62 }
  0xe0   :  { %v151_v2 = vadd.f32 %v138_v62, %v133_v0  ;;  %v161_v3 = vmul.f32 %v133_v0, %v133_v0  ;;  %v979_v4 = vpop.f32.mrb[2].mxu0 }
  0xe1   :  { %v142_v6 = vpop.f32.mrb[3].mxu0  ;;  %v148_v8 = vadd.f32 %v979_v4, %v51_v5  ;;  %v244_v4 = vld [vmem:[%s1404_s1 + $0x48] sm:$0xff]  ;;  %v245_v5 = vld [vmem:[%s1404_s1 + $0x50] sm:$0xff] }
  0xe2   :  { %v165_v7 = vadd.f32 %v162_v1, %v161_v3  ;;  %v143_v9 = vadd.f32 %v142_v6, %v46_v59  ;;  %v241_v1 = vld [vmem:[%s1404_s1 + $0x30] sm:$0xff]  ;;  %v243_v3 = vld [vmem:[%s1404_s1 + $0x40] sm:$0xff]  ;;  %v246_v6 = vld [vmem:[%s1404_s1 + $0x58] sm:$0xff] }
  0xe3   :  { %v164_v12 = vmul.f32 %v148_v8, %v148_v8 }
  0xe4   :  { %v152_v10 = vadd.f32 %v151_v2, %v143_v9  ;;  %v163_v11 = vmul.f32 %v143_v9, %v143_v9  ;;  %v242_v2 = vld [vmem:[%s1404_s1 + $0x38] sm:$0xff] }
  0xe6   :  { %v153_v13 = vadd.f32 %v152_v10, %v148_v8  ;;  %v166_v14 = vadd.f32 %v165_v7, %v163_v11  ;;  %v601_v7 = vld [vmem:[%s1404_s1 + $0x60] sm:$0xff] }
  0xe7   :  { %1016 = vmatprep.mubr.msk.f32.mxu0 %vm637_vm2, %v601_v7 }
  0xe8   :  { %v154_v15 = vrot.slane %v153_v13, 4  ;;  %v167_v16 = vadd.f32 %v166_v14, %v164_v12 }
  0xea   :  { %v155_v17 = vadd.f32 %v154_v15, %v153_v13  ;;  %v168_v18 = vrot.slane %v167_v16, 4 }
  0xec   :  { %v156_v19 = vrot.slane %v155_v17, 2  ;;  %v169_v20 = vadd.f32 %v168_v18, %v167_v16 }
  0xee   :  { %v157_v21 = vadd.f32 %v156_v19, %v155_v17  ;;  %v170_v22 = vrot.slane %v169_v20, 2 }
  0xf0   :  { %v158_v23 = vrot.slane %v157_v21, 1  ;;  %v171_v24 = vadd.f32 %v170_v22, %v169_v20 }
  0xf2   :  { %v159_v25 = vadd.f32 %v158_v23, %v157_v21  ;;  %v172_v26 = vrot.slane %v171_v24, 1 }
  0xf4   :  { %v160_v27 = vmul.f32 0.03125, %v159_v25  ;;  %v173_v28 = vadd.f32 %v172_v26, %v171_v24 }
  0xf6   :  { %v174_v29 = vmul.f32 0.03125, %v173_v28  ;;  %v175_v30 = vmul.f32 %v160_v27, %v160_v27  ;;  %v179_v31 = vsub.f32 %v143_v9, %v160_v27  ;;  %v177_v32 = vsub.f32 %v133_v0, %v160_v27  ;;  %v240_v0 = vld [vmem:[%s1404_s1 + $0x28] sm:$0xff]  ;;  %v279_v9 = vpop.permute.xlu1 %278 }
  0xf7   :  { %v178_v33 = vsub.f32 %v138_v62, %v160_v27  ;;  %v180_v34 = vsub.f32 %v148_v8, %v160_v27  ;;  %v274_v8 = vpop.permute.xlu0 %273 }
  0xf8   :  { %v176_v37 = vsub.f32 %v174_v29, %v175_v30 }
  0xfa   :  { %v181_v38 = vadd.f32 1e-05, %v176_v37  ;;  %v289_v11 = vpop.permute.xlu1 %288 }
  0xfb   :  { %v284_v10 = vpop.permute.xlu0 %283 }
  0xfc   :  { %1074 = vrsqrt.f32 %v181_v38 }
  0xfe   :  { %v299_v14 = vpop.permute.xlu1 %298 }
  0xff   :  { %v294_v12 = vpop.permute.xlu0 %293 }
 0x102   :  { %v309_v27 = vpop.permute.xlu1 %308 }
 0x103   :  { %v304_v23 = vpop.permute.xlu0 %303 }
 0x106   :  { %v1075_v43 = vpop.eup %1074 }
 0x107   :  { %v185_v44 = vmul.f32 %v1075_v43, %v179_v31  ;;  %v183_v45 = vmul.f32 %v1075_v43, %v177_v32  ;;  %v184_v46 = vmul.f32 %v1075_v43, %v178_v33  ;;  %v186_v47 = vmul.f32 %v1075_v43, %v180_v34  ;;  %v1358_v37 = vpop.permute.xlu0 %499 }
 0x109   :  { %v207_v48 = vmul.f32 %v190_v36, %v183_v45  ;;  %v208_v49 = vmul.f32 %v195_v35, %v184_v46  ;;  %v209_v50 = vmul.f32 %v200_v42, %v185_v44  ;;  %v210_v51 = vmul.f32 %v205_v41, %v186_v47  ;;  %v505_v42 = vpop.permute.xlu1 %504 }
 0x10b   :  { %v231_v54 = vadd.f32 %v214_v40, %v207_v48  ;;  %v232_v55 = vadd.f32 %v219_v39, %v208_v49  ;;  %v233_v56 = vadd.f32 %v224_v53, %v209_v50  ;;  %v234_v57 = vadd.f32 %v229_v52, %v210_v51  ;;  %v548_v52 = vpop.permute.xlu0 %547 }
 0x10d   :  { %v235_v58 = vmax.f32 %v231_v54, 0.0  ;;  %v236_v59 = vmax.f32 %v232_v55, 0.0  ;;  %v237_v60 = vmax.f32 %v233_v56, 0.0  ;;  %v238_v61 = vmax.f32 %v234_v57, 0.0  ;;  %v553_v56 = vpop.permute.xlu1 %552 }
 0x10f   :  { %v1037_v62 = vpack.c.bf16 %v236_v59, %v235_v58  ;;  %v1041_v63 = vpack.c.bf16 %v238_v61, %v237_v60  ;;  %v510_v61 = vpop.permute.xlu0 %509 }
 0x111   :  { %1038 = vmatprep.subr.bf16.mxu1 %v1037_v62 }
 0x112   :  { %1040 = vmatpush3.bf16.msra.mxu1 %v1037_v62 }
 0x113   :  { %1042 = vmatprep.subr.bf16.mxu1 %v1041_v63 }
 0x116   :  { %1044 = vmatpush3.bf16.msra.mxu1 %v1041_v63 }
 0x119   :  { %989 = vmatmul.mubr.msk.f32.vlgmr.msra.gmra.mrb[0].mxu1 %vm311_vm1, %v240_v0  ;;  %v515_v0 = vpop.permute.xlu1 %514 }
 0x11a   :  { %991 = vmatprep.mubr.msk.f32.mxu1 %vm311_vm1, %v241_v1 }
 0x11d   :  { %992 = vmatmul.mubr.msk.f32.gmra.mrb[2].mxu1 %vm311_vm1, %v242_v2 }
 0x11e   :  { %994 = vmatprep.mubr.msk.f32.mxu1 %vm311_vm1, %v243_v3 }
 0x121   :  { %995 = vmatmul.mubr.msk.f32.gmra.mrb[4].mxu1 %vm311_vm1, %v244_v4 }
 0x122   :  { %997 = vmatprep.mubr.msk.f32.mxu1 %vm311_vm1, %v245_v5  ;;  %v558_v5 = vpop.permute.xlu0 %557 }
 0x125   :  { %998 = vmatmul.mubr.msk.f32.gmra.mrb[6].mxu1 %vm311_vm1, %v246_v6 }
 0x1ec   :  { %v990_v13 = vpop.f32.mrb[0].mxu1 }
 0x1ed   :  { %v1334_v15 = vadd.f32 %v990_v13, %v279_v9  ;;  %v402_v16 = vpop.f32.mrb[1].mxu1 }
 0x1ee   :  { %v1336_v17 = vadd.f32 %v402_v16, %v274_v8  ;;  %v563_v8 = vpop.permute.xlu1 %562 }
 0x1ef   :  { %v456_v18 = vmul.f32 %v1334_v15, %v1334_v15 }
 0x1f0   :  { %v441_v19 = vadd.f32 %v1334_v15, %v1336_v17  ;;  %v455_v20 = vmul.f32 %v1336_v17, %v1336_v17  ;;  %v993_v21 = vpop.f32.mrb[2].mxu1 }
 0x1f1   :  { %v412_v22 = vpop.f32.mrb[3].mxu1  ;;  %v1344_v25 = vadd.f32 %v993_v21, %v289_v11  ;;  %v520_v21 = vpop.permute.xlu0 %519 }
 0x1f2   :  { %v463_v24 = vadd.f32 %v456_v18, %v455_v20  ;;  %v1346_v26 = vadd.f32 %v412_v22, %v284_v10 }
 0x1f3   :  { %v458_v33 = vmul.f32 %v1344_v25, %v1344_v25 }
 0x1f4   :  { %v442_v28 = vadd.f32 %v441_v19, %v1346_v26  ;;  %v457_v29 = vmul.f32 %v1346_v26, %v1346_v26  ;;  %v996_v30 = vpop.f32.mrb[4].mxu1 }
 0x1f5   :  { %v1351_v31 = vadd.f32 %v996_v30, %v299_v14  ;;  %v422_v32 = vpop.f32.mrb[5].mxu1 }
 0x1f6   :  { %v464_v34 = vadd.f32 %v463_v24, %v457_v29  ;;  %v1355_v35 = vadd.f32 %v422_v32, %v294_v12  ;;  %v443_v36 = vadd.f32 %v442_v28, %v1344_v25  ;;  %v568_v29 = vpop.permute.xlu0 %567 }
 0x1f7   :  { %v460_v43 = vmul.f32 %v1351_v31, %v1351_v31 }
 0x1f8   :  { %v444_v38 = vadd.f32 %v443_v36, %v1355_v35  ;;  %v459_v39 = vmul.f32 %v1355_v35, %v1355_v35  ;;  %v465_v40 = vadd.f32 %v464_v34, %v458_v33  ;;  %v999_v41 = vpop.f32.mrb[6].mxu1 }
 0x1f9   :  { %v432_v44 = vpop.f32.mrb[7].mxu1  ;;  %v438_v46 = vadd.f32 %v999_v41, %v309_v27  ;;  %v525_v27 = vpop.permute.xlu1 %524 }
 0x1fa   :  { %v466_v45 = vadd.f32 %v465_v40, %v459_v39  ;;  %v433_v47 = vadd.f32 %v432_v44, %v304_v23  ;;  %v445_v48 = vadd.f32 %v444_v38, %v1351_v31  ;;  %v530_v32 = vpop.permute.xlu0 %529 }
 0x1fb   :  { %v462_v53 = vmul.f32 %v438_v46, %v438_v46 }
 0x1fc   :  { %v446_v49 = vadd.f32 %v445_v48, %v433_v47  ;;  %v461_v50 = vmul.f32 %v433_v47, %v433_v47  ;;  %v467_v51 = vadd.f32 %v466_v45, %v460_v43 }
 0x1fd   :  { %v573_v30 = vpop.permute.xlu1 %572 }
 0x1fe   :  { %v447_v54 = vadd.f32 %v446_v49, %v438_v46  ;;  %v468_v55 = vadd.f32 %v467_v51, %v461_v50  ;;  %v578_v44 = vpop.permute.xlu0 %577 }
 0x200   :  { %v448_v57 = vrot.slane %v447_v54, 4  ;;  %v469_v58 = vadd.f32 %v468_v55, %v462_v53 }
 0x202   :  { %v449_v59 = vadd.f32 %v448_v57, %v447_v54  ;;  %v470_v60 = vrot.slane %v469_v58, 4 }
 0x204   :  { %v450_v62 = vrot.slane %v449_v59, 2  ;;  %v471_v63 = vadd.f32 %v470_v60, %v469_v58 }
 0x206   :  { %v451_v1 = vadd.f32 %v450_v62, %v449_v59  ;;  %v472_v2 = vrot.slane %v471_v63, 2 }
 0x208   :  { %v452_v3 = vrot.slane %v451_v1, 1  ;;  %v473_v4 = vadd.f32 %v472_v2, %v471_v63 }
 0x20a   :  { %v453_v6 = vadd.f32 %v452_v3, %v451_v1  ;;  %v474_v7 = vrot.slane %v473_v4, 1 }
 0x20c   :  { %v454_v9 = vmul.f32 0.015625, %v453_v6  ;;  %v475_v10 = vadd.f32 %v474_v7, %v473_v4  ;;  %v1105_v7 = vmov 0.0|0.0  }
 0x20d   :  { %1061 = vmatprep.subr.bf16.mxu1 %v1105_v7 }
 0x20e   :  { %v476_v11 = vmul.f32 0.015625, %v475_v10  ;;  %v477_v12 = vmul.f32 %v454_v9, %v454_v9  ;;  %v485_v13 = vsub.f32 %v433_v47, %v454_v9  ;;  %v479_v14 = vsub.f32 %v1336_v17, %v454_v9  ;;  %v535_v17 = vpop.permute.xlu1 %534  ;;  %v620_v10 = vpop.permute.xlu0 %619 }
 0x20f   :  { %v480_v16 = vsub.f32 %v1334_v15, %v454_v9  ;;  %v481_v18 = vsub.f32 %v1346_v26, %v454_v9  ;;  %v482_v19 = vsub.f32 %v1344_v25, %v454_v9  ;;  %v483_v20 = vsub.f32 %v1355_v35, %v454_v9 }
 0x210   :  { %v478_v22 = vsub.f32 %v476_v11, %v477_v12  ;;  %v484_v23 = vsub.f32 %v1351_v31, %v454_v9  ;;  %v486_v24 = vsub.f32 %v438_v46, %v454_v9 }
 0x212   :  { %v487_v28 = vadd.f32 1e-05, %v478_v22  ;;  %v583_v49 = vpop.permute.xlu1 %582  ;;  %v630_v22 = vpop.permute.xlu0 %629 }
 0x214   :  { %1076 = vrsqrt.f32 %v487_v28 }
 0x216   :  { %v625_v9 = vpop.permute.xlu1 %624 }
 0x21e   :  { %v1077_v33 = vpop.eup %1076 }
 0x21f   :  { %v495_v15 = vmul.f32 %v1077_v33, %v485_v13  ;;  %v489_v34 = vmul.f32 %v1077_v33, %v479_v14  ;;  %v490_v26 = vmul.f32 %v1077_v33, %v480_v16  ;;  %v491_v36 = vmul.f32 %v1077_v33, %v481_v18  ;;  %v635_v18 = vpop.permute.xlu1 %634 }
 0x220   :  { %v492_v25 = vmul.f32 %v1077_v33, %v482_v19  ;;  %v493_v38 = vmul.f32 %v1077_v33, %v483_v20  ;;  %v494_v35 = vmul.f32 %v1077_v33, %v484_v23  ;;  %v496_v39 = vmul.f32 %v1077_v33, %v486_v24 }
 0x221   :  { %v537_v40 = vmul.f32 %v1358_v37, %v489_v34  ;;  %v538_v31 = vmul.f32 %v505_v42, %v490_v26  ;;  %v539_v41 = vmul.f32 %v510_v61, %v491_v36  ;;  %v543_v43 = vmul.f32 %v530_v32, %v495_v15 }
 0x222   :  { %v540_v45 = vmul.f32 %v515_v0, %v492_v25  ;;  %v541_v46 = vmul.f32 %v520_v21, %v493_v38  ;;  %v542_v47 = vmul.f32 %v525_v27, %v494_v35  ;;  %v544_v48 = vmul.f32 %v535_v17, %v496_v39 }
 0x223   :  { %v585_v50 = vadd.f32 %v548_v52, %v537_v40  ;;  %v586_v51 = vadd.f32 %v553_v56, %v538_v31  ;;  %v587_v53 = vadd.f32 %v558_v5, %v539_v41  ;;  %v591_v54 = vadd.f32 %v578_v44, %v543_v43  ;;  %v602_v52 = vld [vmem:[%s1404_s1 + $0x68] sm:$0xff]  ;;  %v603_v56 = vld [vmem:[%s1404_s1 + $0x70] sm:$0xff]  ;;  %v604_v5 = vld [vmem:[%s1404_s1 + $0x78] sm:$0xff] }
 0x224   :  { %v588_v55 = vadd.f32 %v563_v8, %v540_v45  ;;  %v589_v57 = vadd.f32 %v568_v29, %v541_v46  ;;  %v590_v58 = vadd.f32 %v573_v30, %v542_v47  ;;  %v592_v59 = vadd.f32 %v583_v49, %v544_v48 }
 0x225   :  { %v593_v60 = vmax.f32 %v585_v50, 0.0  ;;  %v594_v62 = vmax.f32 %v586_v51, 0.0  ;;  %v595_v37 = vmax.f32 %v587_v53, 0.0  ;;  %v599_v42 = vmax.f32 %v591_v54, 0.0  ;;  %v779_v53 = vpop.permute.xlu1 %778  ;;  %v774_v54 = vpop.permute.xlu0 %773 }
 0x226   :  { %v596_v61 = vmax.f32 %v588_v55, 0.0  ;;  %v597_v63 = vmax.f32 %v589_v57, 0.0  ;;  %v598_v1 = vmax.f32 %v590_v58, 0.0  ;;  %v600_v0 = vmax.f32 %v592_v59, 0.0 }
 0x227   :  { %v1045_v2 = vpack.c.bf16 %v594_v62, %v593_v60  ;;  %v1107_v8 = vmov 0.0  }
 0x228   :  { %v1049_v3 = vpack.c.bf16 %v596_v61, %v595_v37  ;;  %v1053_v4 = vpack.c.bf16 %v598_v1, %v597_v63  ;;  %v1057_v6 = vpack.c.bf16 %v600_v0, %v599_v42  ;;  %1030 = vmatprep.mubr.msk.f32.mxu1 %vm1106_vm3, %v1107_v8 }
 0x229   :  { %1046 = vmatprep.subr.bf16.mxu0 %v1045_v2  ;;  %v803_v58 = vpop.permute.xlu1 %802  ;;  %v798_v59 = vpop.permute.xlu0 %797 }
 0x22a   :  { %1048 = vmatpush3.bf16.msra.mxu0 %v1045_v2 }
 0x22b   :  { %1050 = vmatprep.subr.bf16.mxu0 %v1049_v3 }
 0x22d   :  { %v789_v60 = vpop.permute.xlu1 %788  ;;  %v784_v62 = vpop.permute.xlu0 %783 }
 0x22e   :  { %1052 = vmatpush3.bf16.msra.mxu0 %v1049_v3 }
 0x22f   :  { %1054 = vmatprep.subr.bf16.mxu0 %v1053_v4 }
 0x232   :  { %1056 = vmatpush3.bf16.msra.mxu0 %v1053_v4 }
 0x233   :  { %1058 = vmatprep.subr.bf16.mxu0 %v1057_v6 }
 0x236   :  { %1060 = vmatpush3.bf16.msra.mxu0 %v1057_v6  ;;  %v813_v6 = vpop.permute.xlu1 %812 }
 0x239   :  { %1017 = vmatmul.mubr.msk.f32.vlgmr.msra.gmra.mrb[4].mxu0 %vm637_vm2, %v602_v52  ;;  %v808_v52 = vpop.permute.xlu0 %807 }
 0x23a   :  { %1019 = vmatprep.mubr.msk.f32.mxu0 %vm637_vm2, %v603_v56 }
 0x23d   :  { %1020 = vmatmul.mubr.msk.f32.gmra.mrb[6].mxu0 %vm637_vm2, %v604_v5 }
 0x30c   :  { %v1018_v11 = vpop.f32.mrb[4].mxu0 }
 0x30d   :  { %v722_v12 = vadd.f32 %v1018_v11, %v625_v9  ;;  %v716_v13 = vpop.f32.mrb[5].mxu0 }
 0x30e   :  { %v717_v14 = vadd.f32 %v716_v13, %v620_v10 }
 0x30f   :  { %v746_v16 = vmul.f32 %v722_v12, %v722_v12 }
 0x310   :  { %v735_v19 = vadd.f32 %v722_v12, %v717_v14  ;;  %v745_v20 = vmul.f32 %v717_v14, %v717_v14  ;;  %v1021_v21 = vpop.f32.mrb[6].mxu0 }
 0x311   :  { %v726_v23 = vpop.f32.mrb[7].mxu0  ;;  %v732_v27 = vadd.f32 %v1021_v21, %v635_v18  ;;  %v823_v18 = vld [vmem:[%s1404_s1 + $0x80] sm:$0xf] }
 0x312   :  { %v749_v24 = vadd.f32 %v746_v16, %v745_v20  ;;  %v727_v28 = vadd.f32 %v726_v23, %v630_v22 }
 0x313   :  { %v748_v32 = vmul.f32 %v732_v27, %v732_v27 }
 0x314   :  { %v736_v29 = vadd.f32 %v735_v19, %v727_v28  ;;  %v747_v30 = vmul.f32 %v727_v28, %v727_v28  ;;  %v828_v19 = vpop.permute.xlu0 %827 }
 0x316   :  { %v737_v17 = vadd.f32 %v736_v29, %v732_v27  ;;  %v750_v33 = vadd.f32 %v749_v24, %v747_v30 }
 0x318   :  { %v738_v15 = vrot.slane %v737_v17, 4  ;;  %v751_v34 = vadd.f32 %v750_v33, %v748_v32 }
 0x31a   :  { %v739_v26 = vadd.f32 %v738_v15, %v737_v17  ;;  %v752_v36 = vrot.slane %v751_v34, 4 }
 0x31c   :  { %v740_v25 = vrot.slane %v739_v26, 2  ;;  %v753_v38 = vadd.f32 %v752_v36, %v751_v34 }
 0x31e   :  { %v741_v35 = vadd.f32 %v740_v25, %v739_v26  ;;  %v754_v39 = vrot.slane %v753_v38, 2 }
 0x320   :  { %v742_v40 = vrot.slane %v741_v35, 1  ;;  %v755_v31 = vadd.f32 %v754_v39, %v753_v38 }
 0x322   :  { %v743_v41 = vadd.f32 %v742_v40, %v741_v35  ;;  %v756_v43 = vrot.slane %v755_v31, 1 }
 0x324   :  { %v744_v44 = vmul.f32 0.03125, %v743_v41  ;;  %v757_v45 = vadd.f32 %v756_v43, %v755_v31 }
 0x326   :  { %v758_v46 = vmul.f32 0.03125, %v757_v45  ;;  %v759_v47 = vmul.f32 %v744_v44, %v744_v44  ;;  %v763_v48 = vsub.f32 %v727_v28, %v744_v44  ;;  %v761_v49 = vsub.f32 %v717_v14, %v744_v44 }
 0x327   :  { %v762_v50 = vsub.f32 %v722_v12, %v744_v44  ;;  %v764_v51 = vsub.f32 %v732_v27, %v744_v44 }
 0x328   :  { %v760_v55 = vsub.f32 %v758_v46, %v759_v47 }
 0x32a   :  { %v765_v57 = vadd.f32 1e-05, %v760_v55 }
 0x32c   :  { %1078 = vrsqrt.f32 %v765_v57 }
 0x336   :  { %v1079_v37 = vpop.eup %1078 }
 0x337   :  { %v769_v42 = vmul.f32 %v1079_v37, %v763_v48  ;;  %v767_v61 = vmul.f32 %v1079_v37, %v761_v49  ;;  %v768_v63 = vmul.f32 %v1079_v37, %v762_v50  ;;  %v770_v1 = vmul.f32 %v1079_v37, %v764_v51 }
 0x339   :  { %v793_v0 = vmul.f32 %v784_v62, %v769_v42  ;;  %v791_v2 = vmul.f32 %v774_v54, %v767_v61  ;;  %v792_v3 = vmul.f32 %v779_v53, %v768_v63  ;;  %v794_v4 = vmul.f32 %v789_v60, %v770_v1 }
 0x33b   :  { %v815_v56 = vadd.f32 %v798_v59, %v791_v2  ;;  %v816_v5 = vadd.f32 %v803_v58, %v792_v3  ;;  %v817_v8 = vadd.f32 %v808_v52, %v793_v0  ;;  %v818_v9 = vadd.f32 %v813_v6, %v794_v4 }
 0x33d   :  { %v819_v10 = vmax.f32 %v815_v56, 0.0  ;;  %v820_v11 = vmax.f32 %v816_v5, 0.0  ;;  %v821_v12 = vmax.f32 %v817_v8, 0.0  ;;  %v822_v13 = vmax.f32 %v818_v9, 0.0 }
 0x33f   :  { %v1062_v14 = vpack.c.bf16 %v820_v11, %v819_v10  ;;  %v1065_v16 = vpack.c.bf16 %v822_v13, %v821_v12 }
 0x341   :  { %1063 = vmatpush3.bf16.msra.mxu1 %v1062_v14 }
 0x342   :  { %1064 = vmatprep.subr.bf16.mxu1 %v1105_v7 }
 0x345   :  { %1066 = vmatpush3.bf16.msra.mxu1 %v1065_v16 }
 0x348   :  { %1031 = vmatmul.mubr.msk.f32.vlgmr.msra.gmra.mrb[8].mxu1 %vm311_vm1, %v823_v18 }
 0x41b   :  { %v899_v20 = vpop.f32.mrb[8].mxu1 }
 0x41c   :  { %v900_v21 = vadd.f32 %v899_v20, %v828_v19  ;;  %v1032_v22 = vpop.f32.mrb[9].mxu1 }
 0x41e   :  { %903 = vst [vmem:[#allocation2] sm:$0xf] %v900_v21 }
 0x41f   :  { %1091 = shalt.err (!%p1088_p4)
}
 0x420   :  { %s1092_s1 = scalar_lea.hbm %s1406_s3, 64 }
 0x421   :  { %p1093_p5 = scmp.ne.s32.totalorder %s1406_s3, %s1092_s1  ;;  %p1096_p6 = scmp.lt.u32.totalorder %s1092_s1, %s1406_s3 }
 0x423   :  { %p1098_p7 = pnand %p1096_p6, %p1093_p5 }
 0x425   :  { %1101 = shalt.err (!%p1098_p7)
}
 0x426   :  { %913 = dma.vmem_to_hbm [thread:$0]  %s911_s8, 64, %s1406_s3, [#allocation3]  }
 0x427   :  { %1102 = dma.done.wait [#allocation3], 64  }
 0x428   :  { %1103 = vsyncadd [#allocation3], 4294967232 }
 0x429   :  { %917 = vsyncpa [#allocation3], 1 }

</bundles_post_ra>
